<compile_context>
chip_gen: v7x
topology: tpu7x:2x2x1
jax: 0.10.0
libtpu: 0.0.40
codegen_flags: <defaults>
</compile_context>

<pallas_src>
import functools

import jax
import jax.numpy as jnp
from jax.experimental import pallas as pl
from jax.experimental.pallas import tpu as pltpu


def _round_up(v: int, m: int) -> int:
    return (v + m - 1) // m * m


def _largest_divisor_tile(total: int, cap: int) -> int:
    """Largest multiple of 128 that divides `total` and is <= cap (>=128)."""
    cap = max(128, min(cap, total))
    best = 128
    t = 128
    while t <= cap:
        if total % t == 0:
            best = t
        t += 128
    return best


def _tpu_hw():
    """(generation string, physical VMEM bytes per core) with safe fallbacks."""
    kind = ""
    try:
        kind = jax.devices()[0].device_kind.lower()
    except Exception:
        pass
    if "v5 lite" in kind or "v5e" in kind or "v5litepod" in kind:
        gen = "v5e"
    elif "v6" in kind or "trillium" in kind:
        gen = "v6e"
    elif "v7" in kind:
        gen = "v7x"
    else:
        gen = "unknown"
    vmem_cap = None
    try:
        vmem_cap = int(pltpu.get_tpu_info().vmem_capacity_bytes)
    except Exception:
        vmem_cap = None
    if vmem_cap is None or vmem_cap <= 0:
        vmem_cap = (64 << 20) if gen == "v7x" else (128 << 20)
    return gen, vmem_cap


def ffn_kernel(x_ref, w1_ref, b1_ref, w2_ref, b2_ref, o_ref, acc_ref):
    # x_ref:  (tm, dm_p)   compute dtype
    # w1_ref: (dm_p, tf)   compute dtype
    # b1_ref: (1, tf)      f32
    # w2_ref: (tf, dm_p)   compute dtype
    # b2_ref: (1, dm_p)    f32
    # o_ref:  (tm, dm_p)   output dtype
    # acc_ref:(tm, dm_p)   f32 VMEM accumulator (resident across k axis)
    k = pl.program_id(1)

    # First matmul on the MXU (f32 accumulate), bias + ReLU in f32 on the VPU.
    h = jnp.dot(x_ref[...], w1_ref[...], preferred_element_type=jnp.float32)
    h = jnp.maximum(h + b1_ref[...], 0.0)

    # Second matmul: cast activation back to MXU dtype, accumulate in f32.
    part = jnp.dot(h.astype(w2_ref.dtype), w2_ref[...],
                   preferred_element_type=jnp.float32)

    @pl.when(k == 0)
    def _init():
        acc_ref[...] = part          # direct write: no zero-fill pass

    @pl.when(k > 0)
    def _accum():
        acc_ref[...] += part

    @pl.when(k == pl.num_programs(1) - 1)
    def _finalize():
        # Fold the second bias in once, at the end of the reduction.
        o_ref[...] = (acc_ref[...] + b2_ref[...]).astype(o_ref.dtype)


@functools.partial(jax.jit, static_argnames=("tm", "tf"))
def _ffn_pallas_call(x2d, w1p, b1p, w2p, b2p, *, tm=None, tf=None):
    """x2d: [N, d_model]; w1p/b1p/w2p/b2p already padded to 128-multiples."""
    N, d_model = x2d.shape
    dm_p, df_p = w1p.shape
    out_dtype = x2d.dtype
    c_dt = w1p.dtype
    cb = jnp.dtype(c_dt).itemsize
    ob = jnp.dtype(out_dtype).itemsize

    gen, vmem_cap = _tpu_hw()

    # ---- generation-aware tile defaults (ridge-point arithmetic intensity) --
    if tm is None:
        tm = {"v5e": 256, "v6e": 768, "v7x": 512}.get(gen, 512)
    if tf is None:
        tf = {"v5e": 1024, "v6e": 1024, "v7x": 512}.get(gen, 512)

    # ---- row tiling (8-aligned sublanes; >=2 parallel tiles when possible) --
    n8 = _round_up(N, 8)
    tm_e = min(tm, n8)
    if 16 <= n8 <= tm_e:
        # Split small inputs into two row tiles so both cores get work.
        tm_e = _round_up((n8 + 1) // 2, 8)
    n_p = _round_up(N, tm_e)

    # ---- d_ff tiling: multiple of 128 that exactly divides padded d_ff ------
    tf_e = _largest_divisor_tile(df_p, tf)

    # ---- VMEM budget: ~0.75x physical, shrink tiles if needed ---------------
    budget = int(0.75 * vmem_cap)

    def vmem_est(tm_, tf_):
        return (2 * (tm_ * dm_p * cb        # x tile (double-buffered)
                     + dm_p * tf_ * cb      # W1 tile
                     + tf_ * 4              # b1 tile
                     + tf_ * dm_p * cb      # W2 tile
                     + dm_p * 4             # b2 tile
                     + tm_ * dm_p * ob)     # output tile
                + tm_ * dm_p * 4)           # f32 accumulator scratch

    while vmem_est(tm_e, tf_e) > budget and tf_e > 128:
        tf_e = _largest_divisor_tile(df_p, max(128, tf_e // 2))
        if tf_e == 128 and vmem_est(tm_e, tf_e) > budget:
            break
    while vmem_est(tm_e, tf_e) > budget and tm_e > 64:
        tm_e = max(64, _round_up(tm_e // 2, 8))
        n_p = _round_up(N, tm_e)

    est = vmem_est(tm_e, tf_e)
    vmem_limit = min(budget, max(32 << 20, int(1.25 * est) + (4 << 20)))

    grid = (n_p // tm_e, df_p // tf_e)
    row_tiles = grid[0]

    # Weights are streamed once per row tile -> include the re-read factor.
    cost = pl.CostEstimate(
        flops=4 * n_p * dm_p * df_p,
        transcendentals=0,
        bytes_accessed=(n_p * dm_p * cb
                        + row_tiles * (dm_p * df_p * cb + df_p * 4
                                       + df_p * dm_p * cb)
                        + dm_p * 4
                        + n_p * dm_p * ob),
    )

    # ---- pad the activation only when necessary -----------------------------
    if (n_p, dm_p) != (N, d_model):
        xp = jnp.zeros((n_p, dm_p), c_dt).at[:N, :d_model].set(x2d.astype(c_dt))
    else:
        xp = x2d.astype(c_dt)

    out_p = pl.pallas_call(
        ffn_kernel,
        out_shape=jax.ShapeDtypeStruct((n_p, dm_p), out_dtype),
        grid_spec=pltpu.PrefetchScalarGridSpec(
            num_scalar_prefetch=0,
            grid=grid,
            in_specs=[
                pl.BlockSpec((tm_e, dm_p), lambda i, k: (i, 0)),   # x row tile
                pl.BlockSpec((dm_p, tf_e), lambda i, k: (0, k)),   # W1 d_ff tile
                pl.BlockSpec((1, tf_e),    lambda i, k: (0, k)),   # b1 tile
                pl.BlockSpec((tf_e, dm_p), lambda i, k: (k, 0)),   # W2 d_ff tile
                pl.BlockSpec((1, dm_p),    lambda i, k: (0, 0)),   # b2
            ],
            out_specs=pl.BlockSpec((tm_e, dm_p), lambda i, k: (i, 0)),
            scratch_shapes=[pltpu.VMEM((tm_e, dm_p), jnp.float32)],
        ),
        compiler_params=pltpu.CompilerParams(
            dimension_semantics=("parallel", "arbitrary"),
            vmem_limit_bytes=vmem_limit,
        ),
        cost_estimate=cost,
    )(xp, w1p, b1p, w2p, b2p)

    if (n_p, dm_p) != (N, d_model):
        return out_p[:N, :d_model]
    return out_p


class PallasFFN:
    """Fused FFN forward (linear_1 -> ReLU -> linear_2). Dropout == identity
    (inference).  Weights are padded / cast exactly once at construction."""

    def __init__(self, w1, b1, w2, b2, compute_dtype=jnp.bfloat16):
        d_model, d_ff = w1.shape
        assert w2.shape == (d_ff, d_model)
        c_dt = jnp.dtype(compute_dtype)
        dm_p = _round_up(d_model, 128)
        df_p = _round_up(d_ff, 128)
        self.d_model, self.d_ff = d_model, d_ff

        if (dm_p, df_p) == (d_model, d_ff):
            # Already lane-aligned: no padded copies, just a one-time cast.
            self.w1p = jnp.asarray(w1, c_dt)
            self.w2p = jnp.asarray(w2, c_dt)
            self.b1p = jnp.asarray(b1, jnp.float32).reshape(1, d_ff)
            self.b2p = jnp.asarray(b2, jnp.float32).reshape(1, d_model)
        else:
            # Zero padding is exact for a linear layer.
            self.w1p = (jnp.zeros((dm_p, df_p), c_dt)
                        .at[:d_model, :d_ff].set(jnp.asarray(w1, c_dt)))
            self.w2p = (jnp.zeros((df_p, dm_p), c_dt)
                        .at[:d_ff, :d_model].set(jnp.asarray(w2, c_dt)))
            self.b1p = (jnp.zeros((1, df_p), jnp.float32)
                        .at[:, :d_ff].set(jnp.asarray(b1, jnp.float32)[None, :]))
            self.b2p = (jnp.zeros((1, dm_p), jnp.float32)
                        .at[:, :d_model].set(jnp.asarray(b2, jnp.float32)[None, :]))

    def __call__(self, x, tm=None, tf=None):
        shape = x.shape
        x2d = x.reshape(-1, shape[-1])
        out = _ffn_pallas_call(x2d, self.w1p, self.b1p, self.w2p, self.b2p,
                               tm=tm, tf=tf)
        return out.reshape(shape)


def init_ffn_params(key, d_model, d_ff, dtype=jnp.float32):
    """Deterministic init mimicking nn.Linear's uniform(-1/sqrt(fan_in), ...)."""
    k1, k2, k3, k4 = jax.random.split(key, 4)
    bound1 = 1.0 / (d_model ** 0.5)
    bound2 = 1.0 / (d_ff ** 0.5)
    # Stored pre-transposed: [d_in, d_out]
    w1 = jax.random.uniform(k1, (d_model, d_ff), dtype, -bound1, bound1)
    b1 = jax.random.uniform(k2, (d_ff,), dtype, -bound1, bound1)
    w2 = jax.random.uniform(k3, (d_ff, d_model), dtype, -bound2, bound2)
    b2 = jax.random.uniform(k4, (d_model,), dtype, -bound2, bound2)
    return w1, b1, w2, b2


if __name__ == "__main__":
    key = jax.random.PRNGKey(0)

    # ---- case 1: small, unaligned dims (exercises the padding path) --------
    batch, seq, d_model, d_ff = 2, 8, 32, 64
    kx, kp, k2 = jax.random.split(key, 3)
    x = jax.random.normal(kx, (batch, seq, d_model), dtype=jnp.float32)
    w1, b1, w2, b2 = init_ffn_params(kp, d_model, d_ff)
    ref = jnp.maximum(x @ w1 + b1, 0.0) @ w2 + b2

    ffn_f32 = PallasFFN(w1, b1, w2, b2, compute_dtype=jnp.float32)
    out_f32 = ffn_f32(x)
    jax.block_until_ready(out_f32)
    assert out_f32.shape == (batch, seq, d_model)
    assert jnp.allclose(out_f32, ref, atol=1e-5, rtol=1e-5), "f32 mismatch vs reference"

    ffn_bf16 = PallasFFN(w1, b1, w2, b2, compute_dtype=jnp.bfloat16)
    out_bf16 = ffn_bf16(x)
    jax.block_until_ready(out_bf16)
    assert out_bf16.shape == (batch, seq, d_model)
    assert jnp.allclose(out_bf16, ref, atol=5e-2, rtol=5e-2), "bf16 mismatch vs reference"

    # ---- case 2: lane-aligned dims (exercises the no-padding fast path) ----
    d_model2, d_ff2, rows = 128, 256, 16
    kxa, kpa = jax.random.split(k2)
    xa = jax.random.normal(kxa, (rows, d_model2), dtype=jnp.float32)
    w1a, b1a, w2a, b2a = init_ffn_params(kpa, d_model2, d_ff2)
    refa = jnp.maximum(xa @ w1a + b1a, 0.0) @ w2a + b2a

    ffn_a = PallasFFN(w1a, b1a, w2a, b2a, compute_dtype=jnp.float32)
    out_a = ffn_a(xa)
    jax.block_until_ready(out_a)
    assert out_a.shape == (rows, d_model2)
    assert jnp.allclose(out_a, refa, atol=1e-5, rtol=1e-5), "aligned-path mismatch"

    print("KERNEL_OK")
</pallas_src>

<mosaic_0001>
module attributes {stable_mosaic.version = 11 : i64} {
  func.func @ffn_kernel(%arg0: i32, %arg1: i32, %arg2: memref<8x128xf32, #tpu.memory_space<vmem>>, %arg3: memref<128x128xf32, #tpu.memory_space<vmem>>, %arg4: memref<1x128xf32, #tpu.memory_space<vmem>>, %arg5: memref<128x128xf32, #tpu.memory_space<vmem>>, %arg6: memref<1x128xf32, #tpu.memory_space<vmem>>, %arg7: memref<8x128xf32, #tpu.memory_space<vmem>>, %arg8: memref<8x128xf32, #tpu.memory_space<vmem>>) attributes {dimension_semantics = [#tpu.dimension_semantics<parallel>, #tpu.dimension_semantics<arbitrary>], iteration_bounds = array<i64: 2, 1>, scalar_prefetch = 0 : i64, scratch_operands = 1 : i64, tpu.core_type = #tpu.core_type<tc>, window_params = [{transform_indices = @transform_0, window_bounds = array<i64: 8, 128>}, {transform_indices = @transform_1, window_bounds = array<i64: 128, 128>}, {transform_indices = @transform_2, window_bounds = array<i64: 1, 128>}, {transform_indices = @transform_3, window_bounds = array<i64: 128, 128>}, {pipeline_mode = #tpu.pipeline_mode<synchronous>, transform_indices = @transform_4, window_bounds = array<i64: 1, 128>}, {transform_indices = @transform_5, window_bounds = array<i64: 8, 128>}]} {
    %c0 = arith.constant 0 : index
    %c0_0 = arith.constant 0 : index
    %0 = vector.load %arg2[%c0, %c0_0] : memref<8x128xf32, #tpu.memory_space<vmem>>, vector<8x128xf32>
    %c0_1 = arith.constant 0 : index
    %c0_2 = arith.constant 0 : index
    %1 = vector.load %arg3[%c0_1, %c0_2] : memref<128x128xf32, #tpu.memory_space<vmem>>, vector<128x128xf32>
    %cst = arith.constant dense<0.000000e+00> : vector<8x128xf32>
    %2 = tpu.matmul %0, %1, %cst {dimension_numbers = #tpu.dot_dimension_numbers<[1], [0], [0], [1], [0, 0, 1, 1], [], []>} : vector<8x128xf32>, vector<128x128xf32>, vector<8x128xf32> -> vector<8x128xf32>
    %c0_3 = arith.constant 0 : index
    %c0_4 = arith.constant 0 : index
    %3 = vector.load %arg4[%c0_3, %c0_4] : memref<1x128xf32, #tpu.memory_space<vmem>>, vector<1x128xf32>
    %4 = vector.broadcast %3 : vector<1x128xf32> to vector<8x128xf32>
    %5 = arith.addf %2, %4 : vector<8x128xf32>
    %cst_5 = arith.constant 0.000000e+00 : f32
    %6 = vector.broadcast %cst_5 : f32 to vector<8x128xf32>
    %7 = arith.maximumf %5, %6 : vector<8x128xf32>
    %c0_6 = arith.constant 0 : index
    %c0_7 = arith.constant 0 : index
    %8 = vector.load %arg5[%c0_6, %c0_7] : memref<128x128xf32, #tpu.memory_space<vmem>>, vector<128x128xf32>
    %cst_8 = arith.constant dense<0.000000e+00> : vector<8x128xf32>
    %9 = tpu.matmul %7, %8, %cst_8 {dimension_numbers = #tpu.dot_dimension_numbers<[1], [0], [0], [1], [0, 0, 1, 1], [], []>} : vector<8x128xf32>, vector<128x128xf32>, vector<8x128xf32> -> vector<8x128xf32>
    %c0_i32 = arith.constant 0 : i32
    %10 = arith.cmpi eq, %arg1, %c0_i32 : i32
    %11 = arith.extui %10 : i1 to i32
    %c0_i32_9 = arith.constant 0 : i32
    %12 = arith.cmpi ne, %11, %c0_i32_9 : i32
    scf.if %12 {
      %c0_14 = arith.constant 0 : index
      %c0_15 = arith.constant 0 : index
      %19 = vector.load %arg8[%c0_14, %c0_15] : memref<8x128xf32, #tpu.memory_space<vmem>>, vector<8x128xf32>
      tpu.vector_store %arg8[%c0_14, %c0_15], %9 {strides = array<i32>} : memref<8x128xf32, #tpu.memory_space<vmem>>, vector<8x128xf32>,
    } else {
    }
    %c0_i32_10 = arith.constant 0 : i32
    %13 = arith.cmpi sgt, %arg1, %c0_i32_10 : i32
    %14 = arith.extui %13 : i1 to i32
    %c0_i32_11 = arith.constant 0 : i32
    %15 = arith.cmpi ne, %14, %c0_i32_11 : i32
    scf.if %15 {
      %c0_14 = arith.constant 0 : index
      %c0_15 = arith.constant 0 : index
      %19 = vector.load %arg8[%c0_14, %c0_15] : memref<8x128xf32, #tpu.memory_space<vmem>>, vector<8x128xf32>
      %20 = arith.addf %19, %9 : vector<8x128xf32>
      %c0_16 = arith.constant 0 : index
      %c0_17 = arith.constant 0 : index
      %21 = vector.load %arg8[%c0_16, %c0_17] : memref<8x128xf32, #tpu.memory_space<vmem>>, vector<8x128xf32>
      tpu.vector_store %arg8[%c0_16, %c0_17], %20 {strides = array<i32>} : memref<8x128xf32, #tpu.memory_space<vmem>>, vector<8x128xf32>,
    } else {
    }
    %c0_i32_12 = arith.constant 0 : i32
    %16 = arith.cmpi eq, %arg1, %c0_i32_12 : i32
    %17 = arith.extui %16 : i1 to i32
    %c0_i32_13 = arith.constant 0 : i32
    %18 = arith.cmpi ne, %17, %c0_i32_13 : i32
    scf.if %18 {
      %c0_14 = arith.constant 0 : index
      %c0_15 = arith.constant 0 : index
      %19 = vector.load %arg8[%c0_14, %c0_15] : memref<8x128xf32, #tpu.memory_space<vmem>>, vector<8x128xf32>
      %c0_16 = arith.constant 0 : index
      %c0_17 = arith.constant 0 : index
      %20 = vector.load %arg6[%c0_16, %c0_17] : memref<1x128xf32, #tpu.memory_space<vmem>>, vector<1x128xf32>
      %21 = vector.broadcast %20 : vector<1x128xf32> to vector<8x128xf32>
      %22 = arith.addf %19, %21 : vector<8x128xf32>
      %c0_18 = arith.constant 0 : index
      %c0_19 = arith.constant 0 : index
      %23 = vector.load %arg7[%c0_18, %c0_19] : memref<8x128xf32, #tpu.memory_space<vmem>>, vector<8x128xf32>
      tpu.vector_store %arg7[%c0_18, %c0_19], %22 {strides = array<i32>} : memref<8x128xf32, #tpu.memory_space<vmem>>, vector<8x128xf32>,
    } else {
    }
    return
  }
  func.func @transform_0(%arg0: i32, %arg1: i32) -> (i32, i32) {
    %c0_i32 = arith.constant 0 : i32
    %c0_i32_0 = arith.constant 0 : i32
    return %arg0, %c0_i32 : i32, i32
  }
  func.func @transform_1(%arg0: i32, %arg1: i32) -> (i32, i32) {
    %c0_i32 = arith.constant 0 : i32
    %c0_i32_0 = arith.constant 0 : i32
    return %c0_i32, %arg1 : i32, i32
  }
  func.func @transform_2(%arg0: i32, %arg1: i32) -> (i32, i32) {
    %c0_i32 = arith.constant 0 : i32
    %c0_i32_0 = arith.constant 0 : i32
    return %c0_i32, %arg1 : i32, i32
  }
  func.func @transform_3(%arg0: i32, %arg1: i32) -> (i32, i32) {
    %c0_i32 = arith.constant 0 : i32
    %c0_i32_0 = arith.constant 0 : i32
    return %arg1, %c0_i32 : i32, i32
  }
  func.func @transform_4(%arg0: i32, %arg1: i32) -> (i32, i32) {
    %c0_i32 = arith.constant 0 : i32
    %c0_i32_0 = arith.constant 0 : i32
    %c0_i32_1 = arith.constant 0 : i32
    return %c0_i32, %c0_i32_0 : i32, i32
  }
  func.func @transform_5(%arg0: i32, %arg1: i32) -> (i32, i32) {
    %c0_i32 = arith.constant 0 : i32
    %c0_i32_0 = arith.constant 0 : i32
    return %arg0, %c0_i32 : i32, i32
  }
}

</mosaic_0001>

<bundles_post_ra>
// kernel: _ffn_pallas_call.1
= control target key start
LH: loop header
LB: loop body
LE: loop exit
PB: predicated region body
PF: predicated region fallthrough
CT: control target
= control target key end

     0   :  { %10 = vsyncpa [#allocation4], 0  ;;  %s1259_s0 = inlined_call_operand.vmem [shape: f32[16,128], index: 0, kind: input, shape index: {}]   ;;  %s1260_s1 = inlined_call_operand.hbm [shape: f32[128,128], index: 1, kind: input, shape index: {}]   ;;  %s1261_s2 = inlined_call_operand.vmem [shape: f32[1,128], index: 2, kind: input, shape index: {}]   ;;  %s1262_s3 = inlined_call_operand.hbm [shape: f32[128,128], index: 3, kind: input, shape index: {}]   ;;  %s1263_s4 = inlined_call_operand.vmem [shape: f32[1,128], index: 4, kind: input, shape index: {}]   ;;  %s1264_s5 = inlined_call_operand.hbm [shape: f32[16,128], index: 5, kind: output, shape index: {}]  }
   0x1   :  { %11 = vsyncpa [#allocation7], 0 }
   0x2   :  { %12 = vsyncpa [#allocation5], 0 }
   0x3   :  { %14 = vsyncpa [#allocation5 + $0x1], 0  ;;  %s1050_s18 = smov 0   ;;  %s1052_s19 = smov 0  }
   0x4   :  { %s1054_s20 = smov 0   ;;  %s1056_s21 = smov 0  }
   0x5   :  { %s1058_s22 = smov 0   ;;  %s1060_s23 = smov 0  }
   0x6 LB: > { %s617_s24 = sadd.s32 4294967295, %s1010_s23   ;;  %s618_s25 = sadd.s32 4294967294, %s1010_s23   ;;  %s1010_s23 = sphi %s1060_s23, %s20_s23   ;;  %s1006_s22 = sphi %s1058_s22, %s1285_s22   ;;  %s1002_s21 = sphi %s1056_s21, %s1284_s21   ;;  %s998_s20 = sphi %s1054_s20, %s1283_s20   ;;  %s994_s19 = sphi %s1052_s19, %s1282_s19   ;;  %s990_s18 = sphi %s1050_s18, %s1281_s18  }
   0x7   : > { %s32_s26 = sadd.s32 1, %s1006_s22  ;;  %s164_s27 = sadd.s32 1, %s998_s20 }
   0x8   : > { %p34_p0 = scmp.ge.s32.totalorder %s32_s26, 2  ;;  %p174_p1 = scmp.ne.s32.totalorder %s998_s20, %s994_s19 }
   0x9   : > { %p175_p2 = scmp.eq.s32.totalorder %s617_s24, 1  ;;  %p180_p3 = scmp.ne.s32.totalorder %s994_s19, %s990_s18 }
   0xa   : > { %s1287_s26 = smov (%p34_p0, %s32_s26), 0  ;;  %p181_p5 = scmp.eq.s32.totalorder %s618_s25, 1 }
   0xb   : > { %1270 = sst [smem:[#allocation12_spill]] %s1287_s26  ;;  %p1090_p4 = por %p175_p2, %p174_p1 }
   0xc   : > { %s161_s29 = ssub.s32 %s1006_s22, %s1287_s26  ;;  %p619_p6 = scmp.ge.s32.totalorder %s1010_s23, 1 }
   0xd   : > { %s1271_s28 = scalar_select %p1090_p4, 1, 0 }
   0xe   : > { %p162_p7 = scmp.eq.s32.totalorder %s161_s29, 0  ;;  %p1097_p8 = por %p181_p5, %p180_p3 }
   0xf   : > { %p188_p9 = scmp.lt.s32.totalorder %s1010_s23, 3  ;;  %p1109_p11 = scmp.eq.s32.totalorder %s617_s24, 0 }
  0x10   : > { %s1272_s30 = scalar_select %p1097_p8, 1, 0 }
  0x11   : > { %s1103_s6 = scalar_select %p162_p7, %s998_s20, %s164_s27  }
  0x12   : > { %p1105_p10 = pnand %p619_p6, %p188_p9  ;;  %s1012_s9 = smov [#allocation3]  }
  0x13   : > { %s1274_s8 = scalar_select %p1109_p11, 1, 0 }
  0x14   : > { %s1273_s7 = scalar_select %p1105_p10, 1, 0 }
  0x15   : > { %p797_p12 = pneg %p1105_p10  ;;  %s202_s10 = sshll.u32 %s1012_s9, 4  ;;  %s203_s10 = int_to_ptr.vmem [resolvable:$true] %s202_s10 }
  0x16   : > { %s1013_s12 = smov [#allocation6]   ;;  %s868_s16 = scalar_lea.hbm %s1260_s1, 2048 }
  0x17   : > { %p1117_p13 = pnand %p1109_p11, %p797_p12  ;;  %s224_s13 = sshll.u32 %s1013_s12, 4  ;;  %s1121_s13 = int_to_ptr.vmem [resolvable:$true] %s224_s13 }
  0x18   : > { %p869_p0 = scmp.ne.s32.totalorder %s1260_s1, %s868_s16  ;;  %p875_p5 = scmp.lt.u32.totalorder %s868_s16, %s1260_s1 }
  0x19   : > { %p870_p1 = pneg %p1117_p13 }
  0x1b   : > { %p871_p2 = pnand %p870_p1, %p869_p0 }
  0x1d   : > { %p872_p3 = pneg %p871_p2 }
  0x1f   : > { %p877_p6 = pnand %p875_p5, %p872_p3 }
  0x21   : > { %880 = shalt.err (!%p877_p6)
}
  0x22   : > { %s881_s29 = scalar_lea.vmem %s203_s10, 2048  ;;  %p889_p8 = scmp.lt.s32.totalorder %s203_s10, %s203_s10 }
  0x23   : > { %p882_p7 = scmp.ne.s32.totalorder %s203_s10, %s881_s29  ;;  %p890_p4 = scmp.lt.s32.totalorder %s881_s29, %s881_s29 }
  0x25   : > { %p884_p9 = pnand %p882_p7, %p870_p1  ;;  %p891_p11 = por %p890_p4, %p889_p8 }
  0x27   : > { %p885_p12 = pneg %p884_p9 }
  0x29   : > { %p892_p10 = pnand %p891_p11, %p885_p12 }
  0x2b   : > { %895 = shalt.err (!%p892_p10)
}
  0x2c   : > { %s1014_s9 = smov 128   ;;  %s1015_s12 = smov 8  }
  0x2d   : > { %800 = dma.hbm_to_vmem [thread:$0]  (!%p1117_p13), %s1260_s1, 2048, %s203_s10, [#allocation4], %s1014_s9, %s1014_s9, %s1015_s12  }
  0x2e   : > { %s896_s24 = scalar_lea.hbm %s1262_s3, 2048 }
  0x2f   : > { %p897_p0 = scmp.ne.s32.totalorder %s1262_s3, %s896_s24  ;;  %p903_p10 = scmp.lt.u32.totalorder %s896_s24, %s1262_s3 }
  0x31   : > { %p899_p4 = pnand %p897_p0, %p870_p1 }
  0x33   : > { %p900_p8 = pneg %p899_p4 }
  0x35   : > { %p905_p11 = pnand %p903_p10, %p900_p8 }
  0x37   : > { %908 = shalt.err (!%p905_p11)
}
  0x38   : > { %s909_s10 = scalar_lea.vmem %s1121_s13, 2048  ;;  %p917_p6 = scmp.lt.s32.totalorder %s1121_s13, %s1121_s13 }
  0x39   : > { %p910_p2 = scmp.ne.s32.totalorder %s1121_s13, %s909_s10  ;;  %p918_p7 = scmp.lt.s32.totalorder %s909_s10, %s909_s10 }
  0x3b   : > { %p912_p3 = pnand %p910_p2, %p870_p1  ;;  %p919_p9 = por %p918_p7, %p917_p6 }
  0x3d   : > { %p913_p5 = pneg %p912_p3 }
  0x3f   : > { %p920_p12 = pnand %p919_p9, %p913_p5 }
  0x41   : > { %923 = shalt.err (!%p920_p12)
}
  0x42   : > { %803 = dma.hbm_to_vmem [thread:$0]  (!%p1117_p13), %s1262_s3, 2048, %s1121_s13, [#allocation7], %s1014_s9, %s1014_s9, %s1015_s12  }
  0x43   : > { %p1276_p0 = scmp.ne.s32.totalorder %s1273_s7, 0 }
  0x44   : > { %p1277_p4 = scmp.ne.s32.totalorder (!%p1276_p0), %s1274_s8, 0 }
  0x45   : > { %250 = sbr.rel (%p1276_p0) target bundleno = 558 (0x22e), region = 40 }
  0x4c   : > { %977 = dma.done.wait (%p1277_p4), [#allocation4], 2048  }
  0x4d   : > { %979 = vsyncadd (%p1277_p4), [#allocation4], 4294965248 }
  0x4e   : > { %981 = dma.done.wait (%p1277_p4), [#allocation7], 2048  }
  0x4f   : > { %983 = vsyncadd (%p1277_p4), [#allocation7], 4294965248  ;;  %v1016_v0 = vmov 0.0|0.0   ;;  %vm1017_vm0 = vmmov 0   ;;  %v1018_v1 = vmov 0.0   ;;  %v293_v2 = vld [vmem:[#allocation3] sm:$0xff] }
  0x50   : > { %739 = vmatprep.subr.bf16.mxu0 %v1016_v0  ;;  %701 = vmatprep.mubr.msk.f32.mxu0 %vm1017_vm0, %v1018_v1  ;;  %v294_v3 = vld [vmem:[#allocation3 + $0x8] sm:$0xff]  ;;  %v295_v4 = vld [vmem:[#allocation3 + $0x10] sm:$0xff]  ;;  %v296_v6 = vld [vmem:[#allocation3 + $0x18] sm:$0xff]  ;;  %p284_p13 = scmp.lt.s32.totalorder %s1002_s21, 1  ;;  %s281_s16 = sand.u32 1, %s994_s19  }
  0x51   : > { %763 = vmatprep.subr.bf16.mxu1 %v1016_v0  ;;  %736 = vmatprep.mubr.msk.f32.mxu1 %vm1017_vm0, %v1018_v1  ;;  %v740_v5 = vpack.c.bf16 %v294_v3, %v293_v2  ;;  %v743_v7 = vpack.c.bf16 %v296_v6, %v295_v4  ;;  %v297_v8 = vld [vmem:[#allocation3 + $0x20] sm:$0xff]  ;;  %v298_v9 = vld [vmem:[#allocation3 + $0x28] sm:$0xff]  ;;  %v389_v12 = vld [vmem:[#allocation6 + $0x10] sm:$0xff]  ;;  %s627_s17 = sshll.u32 %s281_s16, 3  ;;  %s632_s27 = sshll.u32 %s1002_s21, 7 }
  0x52   : > { %v387_v10 = vld [vmem:[#allocation6] sm:$0xff]  ;;  %v388_v11 = vld [vmem:[#allocation6 + $0x8] sm:$0xff]  ;;  %v390_v13 = vld [vmem:[#allocation6 + $0x18] sm:$0xff]  ;;  %v746_v14 = vpack.c.bf16 %v298_v9, %v297_v8  ;;  %s285_s7 = scalar_select %p284_p13, %s1002_s21, 1 }
  0x53   : > { %741 = vmatpush3.bf16.msra.mxu0 %v740_v5  ;;  %v764_v15 = vpack.c.bf16 %v388_v11, %v387_v10  ;;  %v299_v16 = vld [vmem:[#allocation3 + $0x30] sm:$0xff]  ;;  %v300_v17 = vld [vmem:[#allocation3 + $0x38] sm:$0xff]  ;;  %v767_v18 = vpack.c.bf16 %v390_v13, %v389_v12  ;;  %v391_v19 = vld [vmem:[#allocation6 + $0x20] sm:$0xff]  ;;  %s283_s29 = scalar_lea.vmem [#allocation8], %s627_s17  ;;  %p1278_p8 = scmp.ne.s32.totalorder %s1271_s28, 0 }
  0x54   : > { %742 = vmatprep.subr.bf16.mxu0 %v1016_v0  ;;  %v392_v20 = vld [vmem:[#allocation6 + $0x28] sm:$0xff]  ;;  %v749_v21 = vpack.c.bf16 %v300_v17, %v299_v16  ;;  %v301_v22 = vld [vmem:[#allocation3 + $0x40] sm:$0xff]  ;;  %v393_v25 = vld [vmem:[#allocation6 + $0x30] sm:$0xff]  ;;  %s628_s8 = sshll.u32 %s285_s7, 3  ;;  %s512_s10 = sshll.u32 %s283_s29, 4  ;;  %s1214_s10 = int_to_ptr.vmem [resolvable:$true] %s512_s10 }
  0x55   : > { %765 = vmatpush3.bf16.msra.mxu1 %v764_v15  ;;  %v302_v23 = vld [vmem:[#allocation3 + $0x48] sm:$0xff]  ;;  %v770_v24 = vpack.c.bf16 %v392_v20, %v391_v19  ;;  %v394_v26 = vld [vmem:[#allocation6 + $0x38] sm:$0xff]  ;;  %v303_v28 = vld [vmem:[#allocation3 + $0x50] sm:$0xff]  ;;  %s287_s9 = scalar_lea.vmem %s1259_s0, %s628_s8  ;;  %s1212_s7 = scalar_lea.hbm %s1264_s5, %s632_s27 }
  0x56   : > { %766 = vmatprep.subr.bf16.mxu1 %v1016_v0  ;;  %v752_v27 = vpack.c.bf16 %v302_v23, %v301_v22  ;;  %v304_v29 = vld [vmem:[#allocation3 + $0x58] sm:$0xff]  ;;  %v773_v30 = vpack.c.bf16 %v394_v26, %v393_v25  ;;  %v395_v31 = vld [vmem:[#allocation6 + $0x40] sm:$0xff]  ;;  %v396_v32 = vld [vmem:[#allocation6 + $0x48] sm:$0xff]  ;;  %s499_s8 = scalar_lea.sflag [#allocation5], %s281_s16  ;;  %s924_s11 = scalar_lea.vmem %s1214_s10, 128 }
  0x57   : > { %744 = vmatpush3.bf16.msra.mxu0 %v743_v7  ;;  %v755_v33 = vpack.c.bf16 %v304_v29, %v303_v28  ;;  %v305_v34 = vld [vmem:[#allocation3 + $0x60] sm:$0xff]  ;;  %v306_v35 = vld [vmem:[#allocation3 + $0x68] sm:$0xff]  ;;  %v776_v36 = vpack.c.bf16 %v396_v32, %v395_v31  ;;  %v397_v37 = vld [vmem:[#allocation6 + $0x50] sm:$0xff]  ;;  %p925_p1 = scmp.ne.s32.totalorder %s1214_s10, %s924_s11  ;;  %s1019_s21 = smov [#allocation8]  }
  0x58   : > { %745 = vmatprep.subr.bf16.mxu0 %v1016_v0  ;;  %v398_v38 = vld [vmem:[#allocation6 + $0x58] sm:$0xff]  ;;  %v758_v39 = vpack.c.bf16 %v306_v35, %v305_v34  ;;  %v307_v40 = vld [vmem:[#allocation3 + $0x70] sm:$0xff]  ;;  %v399_v43 = vld [vmem:[#allocation6 + $0x60] sm:$0xff]  ;;  %s928_s13 = sshll.u32 %s1019_s21, 4  ;;  %s929_s13 = int_to_ptr.vmem [resolvable:$false] %s928_s13 }
  0x59   : > { %768 = vmatpush3.bf16.msra.mxu1 %v767_v18  ;;  %v308_v41 = vld [vmem:[#allocation3 + $0x78] sm:$0xff]  ;;  %v779_v42 = vpack.c.bf16 %v398_v38, %v397_v37  ;;  %v400_v44 = vld [vmem:[#allocation6 + $0x68] sm:$0xff]  ;;  %v292_v47 = vld [vmem:[%s287_s9] sm:$0xff]  ;;  %p926_p10 = pnand %p925_p1, %p1278_p8  ;;  %s930_s9 = scalar_lea.vmem %s929_s13, 256 }
  0x5a   : > { %769 = vmatprep.subr.bf16.mxu1 %v1016_v0  ;;  %v761_v45 = vpack.c.bf16 %v308_v41, %v307_v40  ;;  %v782_v46 = vpack.c.bf16 %v400_v44, %v399_v43  ;;  %v401_v48 = vld [vmem:[#allocation6 + $0x70] sm:$0xff]  ;;  %v402_v49 = vld [vmem:[#allocation6 + $0x78] sm:$0xff]  ;;  %v629_v51 = vld [vmem:[%s1261_s2] ss:$0 sm:$0xff]  ;;  %p931_p2 = scmp.lt.s32.totalorder %s1214_s10, %s929_s13  ;;  %p932_p3 = scmp.lt.s32.totalorder %s930_s9, %s924_s11 }
  0x5b   : > { %747 = vmatpush3.bf16.msra.mxu0 %v746_v14  ;;  %v785_v50 = vpack.c.bf16 %v402_v49, %v401_v48  ;;  %v630_v56 = vld [vmem:[%s1263_s4] ss:$0 sm:$0xff]  ;;  %p927_p11 = pneg %p926_p10 }
  0x5c   : > { %748 = vmatprep.subr.bf16.mxu0 %v1016_v0  ;;  %p933_p5 = por %p932_p3, %p931_p2 }
  0x5d   : > { %771 = vmatpush3.bf16.msra.mxu1 %v770_v24 }
  0x5e   : > { %772 = vmatprep.subr.bf16.mxu1 %v1016_v0  ;;  %p934_p6 = pnand %p933_p5, %p927_p11 }
  0x5f   : > { %750 = vmatpush3.bf16.msra.mxu0 %v749_v21 }
  0x60   : > { %751 = vmatprep.subr.bf16.mxu0 %v1016_v0 }
  0x61   : > { %774 = vmatpush3.bf16.msra.mxu1 %v773_v30 }
  0x62   : > { %775 = vmatprep.subr.bf16.mxu1 %v1016_v0 }
  0x63   : > { %753 = vmatpush3.bf16.msra.mxu0 %v752_v27 }
  0x64   : > { %754 = vmatprep.subr.bf16.mxu0 %v1016_v0 }
  0x65   : > { %777 = vmatpush3.bf16.msra.mxu1 %v776_v36 }
  0x66   : > { %778 = vmatprep.subr.bf16.mxu1 %v1016_v0 }
  0x67   : > { %756 = vmatpush3.bf16.msra.mxu0 %v755_v33 }
  0x68   : > { %757 = vmatprep.subr.bf16.mxu0 %v1016_v0 }
  0x69   : > { %780 = vmatpush3.bf16.msra.mxu1 %v779_v42 }
  0x6a   : > { %781 = vmatprep.subr.bf16.mxu1 %v1016_v0 }
  0x6b   : > { %759 = vmatpush3.bf16.msra.mxu0 %v758_v39 }
  0x6c   : > { %760 = vmatprep.subr.bf16.mxu0 %v1016_v0 }
  0x6d   : > { %783 = vmatpush3.bf16.msra.mxu1 %v782_v46 }
  0x6e   : > { %784 = vmatprep.subr.bf16.mxu1 %v1016_v0 }
  0x6f   : > { %762 = vmatpush3.bf16.msra.mxu0 %v761_v45 }
  0x71   : > { %786 = vmatpush3.bf16.msra.mxu1 %v785_v50 }
  0x72   : > { %702 = vmatmul.mubr.f32.vlgmr.msra.gmra.mrb[0].mxu0 %v292_v47 }
 0x145   : > { %v382_v52 = vpop.f32.mrb[0].mxu0 }
 0x146   : > { %v383_v53 = vadd.f32 %v629_v51, %v382_v52  ;;  %v703_v54 = vpop.f32.mrb[1].mxu0 }
 0x148   : > { %v386_v55 = vmax.f32 %v383_v53, 0.0 }
 0x14a   : > { %737 = vmatmul.mubr.f32.vlgmr.msra.gmra.mrb[0].mxu1 %v386_v55 }
 0x21d   : > { %v469_v57 = vpop.f32.mrb[0].mxu1 }
 0x21e   : > { %v496_v58 = vadd.f32 %v630_v56, %v469_v57  ;;  %v738_v59 = vpop.f32.mrb[1].mxu1 }
 0x220   : > { %497 = vst [vmem:[%s283_s29] sm:$0xff] %v496_v58 }
 0x221   : > { %937 = shalt.err (!%p934_p6)
}
 0x222   : > { %s938_s12 = scalar_lea.hbm %s1212_s7, 128  ;;  %s942_s17 = scalar_lea.hbm %s1264_s5, 256 }
 0x223   : > { %p939_p7 = scmp.ne.s32.totalorder %s1212_s7, %s938_s12  ;;  %p943_p0 = scmp.lt.u32.totalorder %s1212_s7, %s1264_s5 }
 0x224   : > { %p944_p4 = scmp.lt.u32.totalorder %s942_s17, %s938_s12  ;;  %p946_p1 = scmp.lt.u32.totalorder %s938_s12, %s1212_s7 }
 0x225   : > { %p940_p9 = pnand %p939_p7, %p1278_p8 }
 0x226   : > { %p945_p13 = por %p944_p4, %p943_p0 }
 0x227   : > { %p941_p12 = pneg %p940_p9 }
 0x228   : > { %p947_p10 = por %p946_p1, %p945_p13 }
 0x22a   : > { %p948_p11 = pnand %p947_p10, %p941_p12 }
 0x22c   : > { %951 = shalt.err (!%p948_p11)
}
 0x22d   : > { %795 = dma.vmem_to_hbm [thread:$0]  (%p1278_p8), %s1214_s10, 128, %s1212_s7, %s499_s8  }
 0x22e PF: > { %p812_p2 = scmp.ge.s32.totalorder %s1010_s23, 2  ;;  %s524_s27 = sand.u32 1, %s990_s18  }
 0x22f   : > { %p1279_p3 = scmp.ne.s32.totalorder %s1272_s30, 0  ;;  %s525_s29 = scalar_lea.sflag [#allocation5], %s524_s27 }
 0x231   : > { %p805_p5 = pnand %p812_p2, %p1279_p3 }
 0x233   : > { %985 = dma.done.wait (!%p805_p5), %s525_s29, 128  }
 0x234   : > { %987 = vsyncadd (!%p805_p5), %s525_s29, 4294967168  ;;  %s20_s23 = sadd.s32 1, %s1010_s23   ;;  %s1280_s28 = sld [smem:[#allocation12_spill]] }
 0x235   : > { %p17_p6 = scmp.ge.s32.totalorder %s20_s23, 4   ;;  %s1281_s18 = smov %s994_s19 }
 0x236   : > { %s1282_s19 = smov %s998_s20  ;;  %s1283_s20 = smov %s1103_s6 }
 0x237   : > { %s1284_s21 = smov %s1006_s22  ;;  %19 = sbr.rel (!%p17_p6) target bundleno = 6 (0x6), region = 101 }
 0x23a   : > { %s1285_s22 = smov %s1280_s28 }
 0x23e   :  { %530 = vsyncpa [#allocation4], 1 }
 0x23f   :  { %532 = vsyncpa [#allocation4 + $0x1], 1 }
 0x240   :  { %533 = vsyncpa [#allocation7], 1 }
 0x241   :  { %534 = vsyncpa [#allocation5], 1 }
 0x242   :  { %536 = vsyncpa [#allocation5 + $0x1], 1 }

</bundles_post_ra>
